<compile_context>
chip_gen: v6e
topology: v6e:2x2x1
jax: 0.10.0
libtpu: 0.0.40
codegen_flags: <defaults>
</compile_context>

<pallas_src>
import functools
import math

import jax
import jax.numpy as jnp
from jax.experimental import pallas as pl
from jax.experimental.pallas import tpu as pltpu

_LANES = 128                         # lane-dense last dim
_TARGET_BLOCK_BYTES = 6 * 1024 * 1024   # ~6 MiB per block buffer
_VMEM_LIMIT_BYTES = 48 * 1024 * 1024    # in+out double-buffered ~24 MiB << 48 MiB


def _cdiv(a: int, b: int) -> int:
    return -(-a // b)


def _round_up(a: int, b: int) -> int:
    return ((a + b - 1) // b) * b


def _dropout_kernel(seed_ref, x_ref, o_ref, *, threshold: int, scale: float,
                    tile_rows: int, lanes: int):
    # Global element index (row-major over the lane-dense layout) -> counter
    # for the stateless hash PRNG.  Identical mask regardless of tiling.
    tile = pl.program_id(0)
    row_off = (tile * tile_rows).astype(jnp.uint32)
    rows = jax.lax.broadcasted_iota(jnp.uint32, (tile_rows, lanes), 0)
    cols = jax.lax.broadcasted_iota(jnp.uint32, (tile_rows, lanes), 1)
    idx = (rows + row_off) * jnp.uint32(lanes) + cols

    # lowbias32-style finalizer of (idx ^ seed); final xor-shift dropped (only
    # the top 24 bits are consumed, which it barely affects).  VPU int ops only.
    h = idx ^ seed_ref[0].astype(jnp.uint32)
    h = (h ^ (h >> 16)) * jnp.uint32(0x7FEB352D)
    h = (h ^ (h >> 15)) * jnp.uint32(0x846CA68B)

    # Integer threshold compare on the top 24 bits: keep w.p. (1 - p).
    keep = (h >> 8).astype(jnp.int32) >= jnp.int32(threshold)

    x = x_ref[...]
    # NOTE: scale is rounded once to the input dtype (tiny systematic bias for
    # bf16, e.g. p=0.1 -> 1.109 vs 1.111) — acceptable for dropout.
    s = jnp.asarray(scale, dtype=x.dtype)
    o_ref[...] = jnp.where(keep, x * s, jnp.zeros_like(x))


def graph_dropout_x(x: jax.Array, seed: jax.Array, p: float,
                    training: bool = True) -> jax.Array:
    """Dropout on the node-feature matrix x (any shape; elementwise)."""
    p = float(p)
    if (not training) or p == 0.0:
        return x
    if p >= 1.0:
        # nn.Dropout(p=1) zeroes everything (avoid 1/(1-p) div-by-zero).
        return jnp.zeros_like(x)

    orig_shape = x.shape
    total = int(math.prod(orig_shape))
    if total == 0:
        return x
    assert total < (1 << 32), "uint32 element counter would wrap"

    itemsize = jnp.dtype(x.dtype).itemsize
    pack = max(8, 32 // itemsize)          # packed sublane tile: 8 f32 / 16 bf16 / 32 int8
    max_tile_rows = max(
        pack, (_TARGET_BLOCK_BYTES // (_LANES * itemsize)) // pack * pack)

    # Lane-dense [rows, 128] view.
    #  * fast path (total % 128 == 0): free reshape, no extra HBM traffic;
    #  * ragged path: small flat pad + trailing slice (extra copy, unavoidable).
    padded = (total % _LANES) != 0
    rows = _cdiv(total, _LANES)
    x_flat = x.reshape(-1)
    if padded:
        x_flat = jnp.pad(x_flat, (0, rows * _LANES - total))
    x2d = x_flat.reshape(rows, _LANES)

    # Tile rows: whole array if tiny (block == full array, always legal);
    # otherwise guarantee >= 2 grid steps (v7x megacore) capped at ~6 MiB/block.
    if rows <= pack:
        tile_rows = rows
    elif rows <= max_tile_rows:
        tile_rows = min(max_tile_rows, _round_up(_cdiv(rows, 2), pack))
    else:
        tile_rows = max_tile_rows
    grid = (_cdiv(rows, tile_rows),)   # partial last block is masked by Pallas

    threshold = min(int(round(p * (1 << 24))), 1 << 24)
    scale = 1.0 / (1.0 - p)
    kernel = functools.partial(_dropout_kernel, threshold=threshold,
                               scale=scale, tile_rows=tile_rows, lanes=_LANES)

    seed_arr = jnp.asarray(seed, dtype=jnp.int32).reshape((1,))

    # TODO(synk): when x is donated, input_output_aliases could make this an
    # in-place update (saves the second full-size HBM allocation on v5e).
    out2d = pl.pallas_call(
        kernel,
        out_shape=jax.ShapeDtypeStruct((rows, _LANES), x.dtype),
        grid_spec=pltpu.PrefetchScalarGridSpec(
            num_scalar_prefetch=1,  # seed lands in SMEM
            grid=grid,
            in_specs=[pl.BlockSpec((tile_rows, _LANES), lambda i, seed: (i, 0))],
            out_specs=pl.BlockSpec((tile_rows, _LANES), lambda i, seed: (i, 0)),
        ),
        compiler_params=pltpu.CompilerParams(
            dimension_semantics=("parallel",),     # megacore sharding on v7x
            vmem_limit_bytes=_VMEM_LIMIT_BYTES,    # headroom for 6 MiB blocks
        ),
    )(seed_arr, x2d)

    if padded:
        return out2d.reshape(-1)[:total].reshape(orig_shape)
    return out2d.reshape(orig_shape)


class GraphDropout:
    """JAX/Pallas analogue of the PyTorch GraphDropout module."""

    def __init__(self, p: float):
        self.p = float(p)

    def __call__(self, batch: dict, seed: jax.Array, training: bool = True) -> dict:
        # `batch` is a plain dict standing in for the PyG batch object (glue).
        batch = dict(batch)
        batch["x"] = graph_dropout_x(batch["x"], seed, self.p, training=training)
        return batch


if __name__ == "__main__":
    key = jax.random.PRNGKey(0)
    k1, k2, k3 = jax.random.split(key, 3)

    p = 0.5
    module = GraphDropout(p)
    seed = jnp.array([1234], dtype=jnp.int32)

    # --- main example: small PyG-style batch (fast no-pad path, total % 128 == 0)
    num_nodes, num_features = 16, 32
    x = jax.random.normal(k1, (num_nodes, num_features), dtype=jnp.float32)
    batch = {"x": x, "edge_index": jnp.zeros((2, 8), dtype=jnp.int32)}

    out = jax.block_until_ready(module(batch, seed, training=True)["x"])
    scaled = x / (1.0 - p)
    ok = bool(jnp.all((jnp.abs(out) < 1e-6) | (jnp.abs(out - scaled) < 1e-5)))
    keep_frac = float(jnp.mean((jnp.abs(out) > 1e-6).astype(jnp.float32)))
    assert ok, "dropout output elements must be 0 or x/(1-p)"
    assert 0.1 < keep_frac < 0.9, f"unexpected keep fraction {keep_frac}"

    # Same seed -> same mask (stateless hash PRNG is deterministic).
    out_rep = jax.block_until_ready(module(batch, seed, training=True)["x"])
    assert bool(jnp.all(out == out_rep))

    # Eval mode is the identity (glue-level short-circuit, like nn.Dropout.eval()).
    out_eval = module(batch, seed, training=False)["x"]
    assert bool(jnp.all(out_eval == x))

    # --- ragged total (pad path, single partial-row block)
    xr = jax.random.normal(k2, (13, 7), dtype=jnp.float32)
    outr = jax.block_until_ready(graph_dropout_x(xr, seed, p, training=True))
    ok_r = bool(jnp.all((jnp.abs(outr) < 1e-6)
                        | (jnp.abs(outr - xr / (1.0 - p)) < 1e-5)))
    assert ok_r, "ragged-path output elements must be 0 or x/(1-p)"

    # --- bf16, multi-step cdiv grid with a partial last block
    xb = jax.random.normal(k3, (520, 64), dtype=jnp.bfloat16)
    outb = jax.block_until_ready(graph_dropout_x(xb, seed, p, training=True))
    ok_b = bool(jnp.all((outb == 0) | (outb == xb * jnp.bfloat16(2.0))))
    kf_b = float(jnp.mean((outb != 0).astype(jnp.float32)))
    assert ok_b, "bf16 output elements must be 0 or 2*x"
    assert 0.3 < kf_b < 0.7, f"unexpected bf16 keep fraction {kf_b}"

    print("KERNEL_OK")
</pallas_src>

<mosaic_0001>
module attributes {stable_mosaic.version = 11 : i64} {
  func.func @_dropout_kernel(%arg0: i32, %arg1: memref<1xi32, #tpu.memory_space<smem>>, %arg2: memref<4x128xf32, #tpu.memory_space<vmem>>, %arg3: memref<4x128xf32, #tpu.memory_space<vmem>>) attributes {dimension_semantics = [#tpu.dimension_semantics<parallel>], iteration_bounds = array<i64: 1>, scalar_prefetch = 1 : i64, scratch_operands = 0 : i64, tpu.core_type = #tpu.core_type<tc>, window_params = [{transform_indices = @transform_0, window_bounds = array<i64: 4, 128>}, {transform_indices = @transform_1, window_bounds = array<i64: 4, 128>}]} {
    %c4_i32 = arith.constant 4 : i32
    %0 = arith.muli %arg0, %c4_i32 : i32
    %1 = tpu.iota {dimensions = array<i32: 0>} : vector<4x128xi32>
    %2 = tpu.iota {dimensions = array<i32: 1>} : vector<4x128xi32>
    %3 = vector.broadcast %0 : i32 to vector<4x128xi32>
    %4 = arith.addi %1, %3 : vector<4x128xi32>
    %c128_i32 = arith.constant 128 : i32
    %5 = vector.broadcast %c128_i32 : i32 to vector<4x128xi32>
    %6 = arith.muli %4, %5 : vector<4x128xi32>
    %7 = arith.addi %6, %2 : vector<4x128xi32>
    %c0 = arith.constant 0 : index
    %8 = memref.load %arg1[%c0] : memref<1xi32, #tpu.memory_space<smem>>
    %9 = vector.broadcast %8 : i32 to vector<4x128xi32>
    %10 = arith.xori %7, %9 : vector<4x128xi32>
    %c16_i32 = arith.constant 16 : i32
    %11 = vector.broadcast %c16_i32 : i32 to vector<4x128xi32>
    %12 = arith.shrui %10, %11 : vector<4x128xi32>
    %13 = arith.xori %10, %12 : vector<4x128xi32>
    %c2146121005_i32 = arith.constant 2146121005 : i32
    %14 = vector.broadcast %c2146121005_i32 : i32 to vector<4x128xi32>
    %15 = arith.muli %13, %14 : vector<4x128xi32>
    %c15_i32 = arith.constant 15 : i32
    %16 = vector.broadcast %c15_i32 : i32 to vector<4x128xi32>
    %17 = arith.shrui %15, %16 : vector<4x128xi32>
    %18 = arith.xori %15, %17 : vector<4x128xi32>
    %c-2073254261_i32 = arith.constant -2073254261 : i32
    %19 = vector.broadcast %c-2073254261_i32 : i32 to vector<4x128xi32>
    %20 = arith.muli %18, %19 : vector<4x128xi32>
    %c8_i32 = arith.constant 8 : i32
    %21 = vector.broadcast %c8_i32 : i32 to vector<4x128xi32>
    %22 = arith.shrui %20, %21 : vector<4x128xi32>
    %c8388608_i32 = arith.constant 8388608 : i32
    %23 = vector.broadcast %c8388608_i32 : i32 to vector<4x128xi32>
    %24 = arith.cmpi sge, %22, %23 : vector<4x128xi32>
    %c0_0 = arith.constant 0 : index
    %c0_1 = arith.constant 0 : index
    %25 = vector.load %arg2[%c0_0, %c0_1] : memref<4x128xf32, #tpu.memory_space<vmem>>, vector<4x128xf32>
    %cst = arith.constant 2.000000e+00 : f32
    %26 = vector.broadcast %cst : f32 to vector<4x128xf32>
    %27 = arith.mulf %25, %26 : vector<4x128xf32>
    %cst_2 = arith.constant 0.000000e+00 : f32
    %28 = vector.broadcast %cst_2 : f32 to vector<4x128xf32>
    %29 = arith.select %24, %27, %28 : vector<4x128xi1>, vector<4x128xf32>
    %c0_3 = arith.constant 0 : index
    %c0_4 = arith.constant 0 : index
    %30 = vector.load %arg3[%c0_3, %c0_4] : memref<4x128xf32, #tpu.memory_space<vmem>>, vector<4x128xf32>
    tpu.vector_store %arg3[%c0_3, %c0_4], %29 {strides = array<i32>} : memref<4x128xf32, #tpu.memory_space<vmem>>, vector<4x128xf32>,
    return
  }
  func.func @transform_0(%arg0: i32, %arg1: memref<1xi32, #tpu.memory_space<smem>>) -> (i32, i32) {
    %c0_i32 = arith.constant 0 : i32
    %c0_i32_0 = arith.constant 0 : i32
    return %arg0, %c0_i32 : i32, i32
  }
  func.func @transform_1(%arg0: i32, %arg1: memref<1xi32, #tpu.memory_space<smem>>) -> (i32, i32) {
    %c0_i32 = arith.constant 0 : i32
    %c0_i32_0 = arith.constant 0 : i32
    return %arg0, %c0_i32 : i32, i32
  }
}

</mosaic_0001>

<bundles_post_ra>
// kernel: tpu_custom_call.1
= control target key start
LH: loop header
LB: loop body
LE: loop exit
PB: predicated region body
PF: predicated region fallthrough
CT: control target
= control target key end

     0   :  { %8 = vsyncpa [#allocation5], 0  ;;  %s134_s0 = inlined_call_operand.<no memory space> [shape: s32[1], index: 0, kind: input, shape index: {}]   ;;  %s135_s1 = inlined_call_operand.hbm [shape: f32[4,128], index: 1, kind: input, shape index: {}]   ;;  %s136_s2 = inlined_call_operand.hbm [shape: f32[4,128], index: 2, kind: output, shape index: {}]  }
   0x1   :  { %9 = vsyncpa [#allocation6], 0  ;;  %s108_s9 = smov [#allocation4]  }
   0x2   :  { %s16_s10 = sshll.u32 %s108_s9, 4  ;;  %s17_s10 = int_to_ptr.vmem [resolvable:$true] %s16_s10 }
   0x3   :  { %s72_s11 = scalar_lea.vmem %s17_s10, 64  ;;  %p77_p1 = scmp.lt.s32.totalorder %s17_s10, %s17_s10 }
   0x4   :  { %p73_p0 = scmp.ne.s32.totalorder %s17_s10, %s72_s11  ;;  %p78_p2 = scmp.lt.s32.totalorder %s72_s11, %s72_s11 }
   0x6   :  { %p79_p3 = por %p78_p2, %p77_p1 }
   0x8   :  { %p80_p4 = pnand %p79_p3, %p73_p0 }
   0xa   :  { %83 = shalt.err (!%p80_p4)
}
   0xb   :  { %19 = dma.hbm_to_vmem [thread:$0]  %s135_s1, 64, %s17_s10, [#allocation5]  }
   0xc   :  { %104 = dma.done.wait [#allocation5], 64  }
   0xd   :  { %105 = vsyncadd [#allocation5], 4294967232  ;;  %v24_v0 = vlaneseq  ;;  %v33_v4 = vstv %s134_s0  ;;  %v43_v12 = vld [vmem:[#allocation4] sm:$0xf]  ;;  %s109_s1 = smov [#allocation7]  }
   0xe   :  { %v44_v14 = vmul.f32 2.0, %v43_v12  ;;  %s53_s16 = sshll.u32 %s109_s1, 4  ;;  %s54_s16 = int_to_ptr.vmem [resolvable:$true] %s53_s16 }
   0xf   :  { %v25_v1 = vshrl.u32 %v24_v0, 7  ;;  %v27_v2 = vand.u32 127, %v24_v0  ;;  %s84_s17 = scalar_lea.vmem %s54_s16, 64  ;;  %p89_p6 = scmp.lt.s32.totalorder %s54_s16, %s54_s16 }
  0x10   :  { %p85_p5 = scmp.ne.s32.totalorder %s54_s16, %s84_s17  ;;  %p90_p7 = scmp.lt.s32.totalorder %s84_s17, %s84_s17 }
  0x11   :  { %v30_v3 = vmul.u32 128, %v25_v1 }
  0x12   :  { %p91_p8 = por %p90_p7, %p89_p6 }
  0x13   :  { %v31_v5 = vadd.s32 %v30_v3, %v27_v2 }
  0x14   :  { %p92_p9 = pnand %p91_p8, %p85_p5 }
  0x15   :  { %v34_v6 = vxor.u32 %v33_v4, %v31_v5 }
  0x17   :  { %v35_v7 = vshrl.u32 %v34_v6, 16 }
  0x19   :  { %v36_v8 = vxor.u32 %v35_v7, %v34_v6 }
  0x1b   :  { %v37_v9 = vmul.u32 2146121005, %v36_v8 }
  0x1d   :  { %v38_v10 = vshrl.u32 %v37_v9, 15 }
  0x1f   :  { %v39_v11 = vxor.u32 %v38_v10, %v37_v9 }
  0x21   :  { %v40_v13 = vmul.u32 2221713035, %v39_v11 }
  0x23   :  { %v41_v15 = vshrl.u32 %v40_v13, 8 }
  0x25   :  { %vm42_vm0 = vcmp.ge.s32.totalorder %v41_v15, 8388608 }
  0x26   :  { %v45_v16 = vsel %vm42_vm0, %v44_v14, 0.0 }
  0x27   :  { %46 = vst [vmem:[#allocation7] sm:$0xf] %v45_v16 }
  0x28   :  { %95 = shalt.err (!%p92_p9)
}
  0x29   :  { %56 = dma.vmem_to_hbm [thread:$0]  %s54_s16, 64, %s136_s2, [#allocation6]  }
  0x2a   :  { %106 = dma.done.wait [#allocation6], 64  }
  0x2b   :  { %107 = vsyncadd [#allocation6], 4294967232 }
  0x2c   :  { %60 = vsyncpa [#allocation5], 1 }
  0x2d   :  { %61 = vsyncpa [#allocation6], 1 }

</bundles_post_ra>
